<compile_context>
chip_gen: v6e
topology: v6e:2x2x1
jax: 0.10.0
libtpu: 0.0.40
codegen_flags: <defaults>
</compile_context>

<pallas_src>
import jax
import jax.numpy as jnp
from jax.experimental import pallas as pl
from jax.experimental.pallas import tpu as pltpu


def dqn_kernel(x_ref, w1_ref, b1_ref, w2_ref, b2_ref, o_ref):
    # x_ref:  (tb, 4)   f32      w1_ref: (4, 256) f32     b1_ref: (1, 256) f32
    # w2_ref: (256, 128) bf16 (zero-padded cols beyond n_out)
    # b2_ref: (1, n_out) f32     o_ref:  (tb, n_out) f32
    x = x_ref[...]
    w1 = w1_ref[...]

    # Hidden layer on the VPU: K=4 is too small for an extra MXU pass; the
    # FMAs/XLU broadcasts overlap with the layer-2 MXU pushes below.
    h = x[:, 0:1] * w1[0:1, :]
    h = h + x[:, 1:2] * w1[1:2, :]
    h = h + x[:, 2:3] * w1[2:3, :]
    h = h + x[:, 3:4] * w1[3:4, :]
    # Bias + ReLU in f32 (v5e-safe); single bf16 cast folded into the epilogue.
    h = jnp.maximum(h + b1_ref[...], 0.0).astype(w2_ref.dtype)

    # Output layer on the MXU: bf16 operands, f32 accumulate.
    out = jnp.dot(h, w2_ref[...], preferred_element_type=jnp.float32)

    # Store only the real Q-value columns: HBM writeback stays n_out-wide.
    n_out = o_ref.shape[-1]
    o_ref[...] = out[:, :n_out] + b2_ref[...]


def _round_up(n, m):
    return ((n + m - 1) // m) * m


def dqn_forward(x, w1, b1, w2, b2, *, batch_tile=1024):
    """Fused MLP forward: batch-tiled grid, VMEM-resident weights, narrow output."""
    B, in_dim = x.shape
    H = w1.shape[1]
    n_out = w2.shape[1]

    x = jnp.asarray(x, jnp.float32)
    w1 = jnp.asarray(w1, jnp.float32)
    b1 = jnp.asarray(b1, jnp.float32).reshape(1, H)
    b2 = jnp.asarray(b2, jnp.float32).reshape(1, n_out)

    # MXU-friendly RHS: zero-pad the (H, n_out) projection to 128 lanes and
    # cast to bf16.  One-time wrapper op on a tiny weight; the padded columns
    # never reach HBM on the output side (sliced off in-register).
    w2_pad = _round_up(max(n_out, 1), 128)
    w2_p = (jnp.zeros((H, w2_pad), jnp.float32)
            .at[:, :n_out].set(jnp.asarray(w2, jnp.float32))
            .astype(jnp.bfloat16))

    # Batch tile: sublane-aligned; ensure >=2 grid steps whenever B > 8 so the
    # "parallel" axis can shard across both TensorCores on v7x.
    if B <= 8:
        tb = 8
    elif B >= 2 * batch_tile:
        tb = batch_tile
    else:
        tb = _round_up((B + 1) // 2, 8)   # exactly two tiles
    B_pad = _round_up(B, tb)
    if B_pad != B:
        # Padded rows compute relu(b1) @ w2 + b2 garbage; discarded by [:B].
        x = jnp.pad(x, ((0, B_pad - B), (0, 0)))
    grid = (B_pad // tb,)

    out = pl.pallas_call(
        dqn_kernel,
        out_shape=jax.ShapeDtypeStruct((B_pad, n_out), jnp.float32),
        grid=grid,
        in_specs=[
            pl.BlockSpec((tb, in_dim), lambda i: (i, 0)),   # streams per tile
            pl.BlockSpec((in_dim, H), lambda i: (0, 0)),    # resident, DMA'd once
            pl.BlockSpec((1, H), lambda i: (0, 0)),
            pl.BlockSpec((H, w2_pad), lambda i: (0, 0)),
            pl.BlockSpec((1, n_out), lambda i: (0, 0)),
        ],
        out_specs=pl.BlockSpec((tb, n_out), lambda i: (i, 0)),
        compiler_params=pltpu.CompilerParams(
            dimension_semantics=("parallel",)),
    )(x, w1, b1, w2_p, b2)

    # No wrapper-side copies when the batch is already a tile multiple.
    return out if B_pad == B else out[:B]


def init_params(key):
    """Deterministic params matching PyTorch Linear shapes, stored as (in, out)."""
    k1, k2, k3, k4 = jax.random.split(key, 4)
    lim1 = 1.0 / jnp.sqrt(4.0)
    lim2 = 1.0 / jnp.sqrt(256.0)
    w1 = jax.random.uniform(k1, (4, 256), jnp.float32, -lim1, lim1)
    b1 = jax.random.uniform(k2, (1, 256), jnp.float32, -lim1, lim1)
    w2 = jax.random.uniform(k3, (256, 2), jnp.float32, -lim2, lim2)
    b2 = jax.random.uniform(k4, (1, 2), jnp.float32, -lim2, lim2)
    return w1, b1, w2, b2


if __name__ == "__main__":
    key = jax.random.PRNGKey(0)
    kx, kp = jax.random.split(key)
    batch = 8
    x = jax.random.normal(kx, (batch, 4), jnp.float32)  # CartPole state: 4 features
    w1, b1, w2, b2 = init_params(kp)

    out = dqn_forward(x, w1, b1, w2, b2)
    out = jax.block_until_ready(out)

    # Pure-JAX f32 reference.  The kernel quantizes h and w2 to bf16 for the
    # MXU, so compare at a tolerance covering that quantization (~1e-2).
    ref = jnp.maximum(x @ w1 + b1, 0.0) @ w2 + b2
    assert out.shape == (batch, 2)
    assert jnp.allclose(out, ref, atol=1e-2, rtol=1e-2), (
        float(jnp.max(jnp.abs(out - ref))))

    print("KERNEL_OK")
</pallas_src>

<mosaic_0001>
module attributes {stable_mosaic.version = 11 : i64} {
  func.func @dqn_kernel(%arg0: i32, %arg1: memref<8x4xf32, #tpu.memory_space<vmem>>, %arg2: memref<4x256xf32, #tpu.memory_space<vmem>>, %arg3: memref<1x256xf32, #tpu.memory_space<vmem>>, %arg4: memref<256x128xbf16, #tpu.memory_space<vmem>>, %arg5: memref<1x2xf32, #tpu.memory_space<vmem>>, %arg6: memref<8x2xf32, #tpu.memory_space<vmem>>) attributes {dimension_semantics = [#tpu.dimension_semantics<parallel>], iteration_bounds = array<i64: 1>, scalar_prefetch = 0 : i64, scratch_operands = 0 : i64, tpu.core_type = #tpu.core_type<tc>, window_params = [{transform_indices = @transform_0, window_bounds = array<i64: 8, 4>}, {pipeline_mode = #tpu.pipeline_mode<synchronous>, transform_indices = @transform_1, window_bounds = array<i64: 4, 256>}, {pipeline_mode = #tpu.pipeline_mode<synchronous>, transform_indices = @transform_2, window_bounds = array<i64: 1, 256>}, {pipeline_mode = #tpu.pipeline_mode<synchronous>, transform_indices = @transform_3, window_bounds = array<i64: 256, 128>}, {pipeline_mode = #tpu.pipeline_mode<synchronous>, transform_indices = @transform_4, window_bounds = array<i64: 1, 2>}, {transform_indices = @transform_5, window_bounds = array<i64: 8, 2>}]} {
    %c0 = arith.constant 0 : index
    %c0_0 = arith.constant 0 : index
    %0 = vector.load %arg1[%c0, %c0_0] : memref<8x4xf32, #tpu.memory_space<vmem>>, vector<8x4xf32>
    %c0_1 = arith.constant 0 : index
    %c0_2 = arith.constant 0 : index
    %1 = vector.load %arg2[%c0_1, %c0_2] : memref<4x256xf32, #tpu.memory_space<vmem>>, vector<4x256xf32>
    %2 = vector.extract_strided_slice %0 {offsets = [0, 0], sizes = [8, 1], strides = [1, 1]} : vector<8x4xf32> to vector<8x1xf32>
    %3 = vector.extract_strided_slice %1 {offsets = [0, 0], sizes = [1, 256], strides = [1, 1]} : vector<4x256xf32> to vector<1x256xf32>
    %4 = vector.broadcast %2 : vector<8x1xf32> to vector<8x256xf32>
    %5 = vector.broadcast %3 : vector<1x256xf32> to vector<8x256xf32>
    %6 = arith.mulf %4, %5 : vector<8x256xf32>
    %7 = vector.extract_strided_slice %0 {offsets = [0, 1], sizes = [8, 1], strides = [1, 1]} : vector<8x4xf32> to vector<8x1xf32>
    %8 = vector.extract_strided_slice %1 {offsets = [1, 0], sizes = [1, 256], strides = [1, 1]} : vector<4x256xf32> to vector<1x256xf32>
    %9 = vector.broadcast %7 : vector<8x1xf32> to vector<8x256xf32>
    %10 = vector.broadcast %8 : vector<1x256xf32> to vector<8x256xf32>
    %11 = arith.mulf %9, %10 : vector<8x256xf32>
    %12 = arith.addf %6, %11 : vector<8x256xf32>
    %13 = vector.extract_strided_slice %0 {offsets = [0, 2], sizes = [8, 1], strides = [1, 1]} : vector<8x4xf32> to vector<8x1xf32>
    %14 = vector.extract_strided_slice %1 {offsets = [2, 0], sizes = [1, 256], strides = [1, 1]} : vector<4x256xf32> to vector<1x256xf32>
    %15 = vector.broadcast %13 : vector<8x1xf32> to vector<8x256xf32>
    %16 = vector.broadcast %14 : vector<1x256xf32> to vector<8x256xf32>
    %17 = arith.mulf %15, %16 : vector<8x256xf32>
    %18 = arith.addf %12, %17 : vector<8x256xf32>
    %19 = vector.extract_strided_slice %0 {offsets = [0, 3], sizes = [8, 1], strides = [1, 1]} : vector<8x4xf32> to vector<8x1xf32>
    %20 = vector.extract_strided_slice %1 {offsets = [3, 0], sizes = [1, 256], strides = [1, 1]} : vector<4x256xf32> to vector<1x256xf32>
    %21 = vector.broadcast %19 : vector<8x1xf32> to vector<8x256xf32>
    %22 = vector.broadcast %20 : vector<1x256xf32> to vector<8x256xf32>
    %23 = arith.mulf %21, %22 : vector<8x256xf32>
    %24 = arith.addf %18, %23 : vector<8x256xf32>
    %c0_3 = arith.constant 0 : index
    %c0_4 = arith.constant 0 : index
    %25 = vector.load %arg3[%c0_3, %c0_4] : memref<1x256xf32, #tpu.memory_space<vmem>>, vector<1x256xf32>
    %26 = vector.broadcast %25 : vector<1x256xf32> to vector<8x256xf32>
    %27 = arith.addf %24, %26 : vector<8x256xf32>
    %cst = arith.constant 0.000000e+00 : f32
    %28 = vector.broadcast %cst : f32 to vector<8x256xf32>
    %29 = arith.maximumf %27, %28 : vector<8x256xf32>
    %30 = arith.truncf %29 : vector<8x256xf32> to vector<8x256xbf16>
    %c0_5 = arith.constant 0 : index
    %c0_6 = arith.constant 0 : index
    %31 = vector.load %arg4[%c0_5, %c0_6] : memref<256x128xbf16, #tpu.memory_space<vmem>>, vector<256x128xbf16>
    %cst_7 = arith.constant dense<0.000000e+00> : vector<8x128xf32>
    %32 = tpu.matmul %30, %31, %cst_7 {dimension_numbers = #tpu.dot_dimension_numbers<[1], [0], [0], [1], [0, 0, 1, 1], [], []>} : vector<8x256xbf16>, vector<256x128xbf16>, vector<8x128xf32> -> vector<8x128xf32>
    %33 = vector.extract_strided_slice %32 {offsets = [0, 0], sizes = [8, 2], strides = [1, 1]} : vector<8x128xf32> to vector<8x2xf32>
    %c0_8 = arith.constant 0 : index
    %c0_9 = arith.constant 0 : index
    %34 = vector.load %arg5[%c0_8, %c0_9] : memref<1x2xf32, #tpu.memory_space<vmem>>, vector<1x2xf32>
    %35 = vector.broadcast %34 : vector<1x2xf32> to vector<8x2xf32>
    %36 = arith.addf %33, %35 : vector<8x2xf32>
    %c0_10 = arith.constant 0 : index
    %c0_11 = arith.constant 0 : index
    %37 = vector.load %arg6[%c0_10, %c0_11] : memref<8x2xf32, #tpu.memory_space<vmem>>, vector<8x2xf32>
    tpu.vector_store %arg6[%c0_10, %c0_11], %36 {strides = array<i32>} : memref<8x2xf32, #tpu.memory_space<vmem>>, vector<8x2xf32>,
    return
  }
  func.func @transform_0(%arg0: i32) -> (i32, i32) {
    %c0_i32 = arith.constant 0 : i32
    %c0_i32_0 = arith.constant 0 : i32
    return %arg0, %c0_i32 : i32, i32
  }
  func.func @transform_1(%arg0: i32) -> (i32, i32) {
    %c0_i32 = arith.constant 0 : i32
    %c0_i32_0 = arith.constant 0 : i32
    %c0_i32_1 = arith.constant 0 : i32
    return %c0_i32, %c0_i32_0 : i32, i32
  }
  func.func @transform_2(%arg0: i32) -> (i32, i32) {
    %c0_i32 = arith.constant 0 : i32
    %c0_i32_0 = arith.constant 0 : i32
    %c0_i32_1 = arith.constant 0 : i32
    return %c0_i32, %c0_i32_0 : i32, i32
  }
  func.func @transform_3(%arg0: i32) -> (i32, i32) {
    %c0_i32 = arith.constant 0 : i32
    %c0_i32_0 = arith.constant 0 : i32
    %c0_i32_1 = arith.constant 0 : i32
    return %c0_i32, %c0_i32_0 : i32, i32
  }
  func.func @transform_4(%arg0: i32) -> (i32, i32) {
    %c0_i32 = arith.constant 0 : i32
    %c0_i32_0 = arith.constant 0 : i32
    %c0_i32_1 = arith.constant 0 : i32
    return %c0_i32, %c0_i32_0 : i32, i32
  }
  func.func @transform_5(%arg0: i32) -> (i32, i32) {
    %c0_i32 = arith.constant 0 : i32
    %c0_i32_0 = arith.constant 0 : i32
    return %arg0, %c0_i32 : i32, i32
  }
}

</mosaic_0001>

<bundles_post_ra>
// kernel: tpu_custom_call.1
= control target key start
LH: loop header
LB: loop body
LE: loop exit
PB: predicated region body
PF: predicated region fallthrough
CT: control target
= control target key end

     0   :  { %10 = vsyncpa [#allocation3], 0  ;;  %s431_s18 = smov [#allocation2]   ;;  %s486_s0 = inlined_call_operand.vmem [shape: f32[8,4], index: 0, kind: input, shape index: {}]   ;;  %s487_s1 = inlined_call_operand.vmem [shape: f32[4,256], index: 1, kind: input, shape index: {}]   ;;  %s488_s2 = inlined_call_operand.vmem [shape: f32[1,256], index: 2, kind: input, shape index: {}]   ;;  %s489_s3 = inlined_call_operand.hbm [shape: bf16[256,128], index: 3, kind: input, shape index: {}]   ;;  %s490_s4 = inlined_call_operand.vmem [shape: f32[1,2], index: 4, kind: input, shape index: {}]   ;;  %s491_s5 = inlined_call_operand.vmem [shape: f32[8,2], index: 5, kind: output, shape index: {}]  }
   0x1   :  { %s22_s19 = sshll.u32 %s431_s18, 4  ;;  %s23_s19 = int_to_ptr.vmem [resolvable:$true] %s22_s19 }
   0x2   :  { %s417_s20 = scalar_lea.vmem %s23_s19, 2048  ;;  %p422_p1 = scmp.lt.s32.totalorder %s23_s19, %s23_s19 }
   0x3   :  { %p418_p0 = scmp.ne.s32.totalorder %s23_s19, %s417_s20  ;;  %p423_p2 = scmp.lt.s32.totalorder %s417_s20, %s417_s20 }
   0x5   :  { %p424_p3 = por %p423_p2, %p422_p1 }
   0x7   :  { %p425_p4 = pnand %p424_p3, %p418_p0 }
   0x9   :  { %428 = shalt.err (!%p425_p4)
}
   0xa   :  { %s432_s21 = smov 64   ;;  %s433_s22 = smov 4  }
   0xb   :  { %28 = dma.hbm_to_vmem [thread:$0]  %s489_s3, 2048, %s23_s19, [#allocation3], %s432_s21, %s432_s21, %s433_s22  }
   0xc   :  { %429 = dma.done.wait [#allocation3], 2048  }
   0xd   :  { %430 = vsyncadd [#allocation3], 4294965248  ;;  %v434_v0 = vmov 0   ;;  %v435_v1 = vmov 2   ;;  %v35_v2 = vld [vmem:[%s486_s0] sm:$0xff]  ;;  %v393_v3 = vld [vmem:[#allocation2 + $0x78] sm:$0xff]   ;;  %v43_v21 = vlaneseq }
   0xe   :  { %388 = vset.pattern.permute.xlu0 %v434_v0  ;;  %390 = vset.pattern.permute.xlu1 %v435_v1  ;;  %v394_v4 = vld [vmem:[#allocation2 + $0x38] sm:$0xff]   ;;  %v395_v5 = vld [vmem:[#allocation2 + $0x70] sm:$0xff]   ;;  %v436_v7 = vmov 1   ;;  %v437_v8 = vmov 3   ;;  %v397_v9 = vld [vmem:[#allocation2 + $0x68] sm:$0xff]   ;;  %vm335_vm0 = vcmask 15360  }
   0xf   :  { %39 = vperm.xlu0 %388, %v35_v2   ;;  %90 = vperm.xlu1 %390, %v35_v2   ;;  %v396_v6 = vld [vmem:[#allocation2 + $0x30] sm:$0xff]   ;;  %v398_v10 = vld [vmem:[#allocation2 + $0x28] sm:$0xff]   ;;  %v399_v11 = vld [vmem:[#allocation2 + $0x60] sm:$0xff]   ;;  %v44_v22 = vshrl.u32 %v43_v21, 7 }
  0x10   :  { %359 = vmatprep.subr.bf16.mxu0 %v393_v3  ;;  %v400_v12 = vld [vmem:[#allocation2 + $0x20] sm:$0xff]   ;;  %v401_v13 = vld [vmem:[#allocation2 + $0x58] sm:$0xff]   ;;  %v403_v15 = vld [vmem:[#allocation2 + $0x50] sm:$0xff]  }
  0x11   :  { %360 = vmatpush3.bf16.msra.mxu0 %v394_v4  ;;  %v402_v14 = vld [vmem:[#allocation2 + $0x18] sm:$0xff]   ;;  %v404_v16 = vld [vmem:[#allocation2 + $0x10] sm:$0xff]   ;;  %v405_v17 = vld [vmem:[#allocation2 + $0x48] sm:$0xff]   ;;  %v45_v23 = vsub.s32 0, %v44_v22  ;;  %v49_v24 = vsub.s32 4, %v44_v22  ;;  %v69_v25 = vsub.s32 1, %v44_v22 }
  0x12   :  { %361 = vmatprep.subr.bf16.mxu0 %v395_v5  ;;  %v406_v18 = vld [vmem:[#allocation2 + $0x8] sm:$0xff]   ;;  %v407_v19 = vld [vmem:[#allocation2 + $0x40] sm:$0xff]   ;;  %v73_v26 = vsub.s32 5, %v44_v22  ;;  %v95_v28 = vsub.s32 2, %v44_v22  ;;  %v99_v29 = vsub.s32 6, %v44_v22  ;;  %v121_v30 = vsub.s32 3, %v44_v22 }
  0x13   :  { %389 = vset.pattern.permute.xlu0 %v436_v7  ;;  %391 = vset.pattern.permute.xlu1 %v437_v8  ;;  %v408_v20 = vld [vmem:[#allocation2] sm:$0xff]   ;;  %v125_v31 = vsub.s32 7, %v44_v22 }
  0x14   :  { %64 = vperm.xlu0 %389, %v35_v2   ;;  %116 = vperm.xlu1 %391, %v35_v2   ;;  %v36_v27 = vld [vmem:[%s487_s1] sm:$0xff] }
  0x15   :  { %362 = vmatpush3.bf16.msra.mxu0 %v396_v6  ;;  %v46_v32 = vrot.slane %v36_v27, %v45_v23  ;;  %v50_v33 = vrot.slane %v36_v27, %v49_v24  ;;  %v70_v34 = vrot.slane %v36_v27, %v69_v25  ;;  %v74_v35 = vrot.slane %v36_v27, %v73_v26  ;;  %v141_v58 = vld [vmem:[%s488_s2] sm:$0x3] }
  0x16   :  { %363 = vmatprep.subr.bf16.mxu0 %v397_v9  ;;  %v96_v36 = vrot.slane %v36_v27, %v95_v28  ;;  %v100_v37 = vrot.slane %v36_v27, %v99_v29  ;;  %v122_v40 = vrot.slane %v36_v27, %v121_v30  ;;  %v126_v41 = vrot.slane %v36_v27, %v125_v31 }
  0x17   :  { %v56_v42 = vrot.slane %v46_v32, %v45_v23  ;;  %v60_v43 = vrot.slane %v50_v33, %v45_v23  ;;  %v80_v44 = vrot.slane %v70_v34, %v69_v25  ;;  %v84_v45 = vrot.slane %v74_v35, %v69_v25 }
  0x18   :  { %392 = vset.pattern.permute.xlu0 %v437_v8  ;;  %v106_v46 = vrot.slane %v96_v36, %v95_v28  ;;  %v110_v47 = vrot.slane %v100_v37, %v95_v28  ;;  %v132_v48 = vrot.slane %v122_v40, %v121_v30  ;;  %v136_v49 = vrot.slane %v126_v41, %v121_v30 }
  0x19   :  { %364 = vmatpush3.bf16.msra.mxu0 %v398_v10  ;;  %v146_v1 = vrot.slane %v141_v58, %v45_v23  ;;  %v150_v2 = vrot.slane %v141_v58, %v69_v25 }
  0x1a   :  { %365 = vmatprep.subr.bf16.mxu0 %v399_v11 }
  0x1d   :  { %366 = vmatpush3.bf16.msra.mxu0 %v400_v12 }
  0x1e   :  { %367 = vmatprep.subr.bf16.mxu0 %v401_v13  ;;  %v358_v13 = vld [vmem:[%s490_s4] ss:$0 sm:$0xff] }
  0x21   :  { %368 = vmatpush3.bf16.msra.mxu0 %v402_v14 }
  0x22   :  { %369 = vmatprep.subr.bf16.mxu0 %v403_v15 }
  0x25   :  { %370 = vmatpush3.bf16.msra.mxu0 %v404_v16 }
  0x26   :  { %371 = vmatprep.subr.bf16.mxu0 %v405_v17 }
  0x29   :  { %372 = vmatpush3.bf16.msra.mxu0 %v406_v18 }
  0x2a   :  { %373 = vmatprep.subr.bf16.mxu0 %v407_v19 }
  0x2d   :  { %374 = vmatpush3.bf16.msra.mxu0 %v408_v20 }
  0x8a   :  { %v40_v38 = vpop.permute.xlu0 %39  ;;  %v91_v39 = vpop.permute.xlu1 %90 }
  0x8b   :  { %v61_v52 = vmul.f32 %v56_v42, %v40_v38  ;;  %v62_v53 = vmul.f32 %v60_v43, %v40_v38  ;;  %v111_v56 = vmul.f32 %v106_v46, %v91_v39  ;;  %v112_v57 = vmul.f32 %v110_v47, %v91_v39 }
  0x8f   :  { %v65_v50 = vpop.permute.xlu0 %64  ;;  %v117_v51 = vpop.permute.xlu1 %116 }
  0x90   :  { %v85_v54 = vmul.f32 %v80_v44, %v65_v50  ;;  %v86_v55 = vmul.f32 %v84_v45, %v65_v50  ;;  %v137_v61 = vmul.f32 %v132_v48, %v117_v51  ;;  %v138_v62 = vmul.f32 %v136_v49, %v117_v51 }
  0x92   :  { %v87_v59 = vadd.f32 %v85_v54, %v61_v52  ;;  %v88_v60 = vadd.f32 %v86_v55, %v62_v53 }
  0x94   :  { %v113_v63 = vadd.f32 %v111_v56, %v87_v59  ;;  %v114_v0 = vadd.f32 %v112_v57, %v88_v60 }
  0x96   :  { %v139_v3 = vadd.f32 %v137_v61, %v113_v63  ;;  %v140_v4 = vadd.f32 %v138_v62, %v114_v0 }
  0x98   :  { %v154_v5 = vadd.f32 %v150_v2, %v140_v4  ;;  %v153_v6 = vadd.f32 %v146_v1, %v139_v3 }
  0x9a   :  { %v156_v7 = vmax.f32 %v154_v5, 0.0  ;;  %v155_v8 = vmax.f32 %v153_v6, 0.0 }
  0x9c   :  { %v158_v9 = vpack.c.bf16 %v156_v7, %v156_v7  ;;  %v157_v10 = vpack.c.bf16 %v155_v8, %v155_v8 }
  0x9e   :  { %319 = vmatprep.mubr.bf16.mxu0 %v158_v9 }
  0x9f   :  { %320 = vmatmul.mubr.bf16.vlgmr.msra.gmra.mxu0 %v157_v10 }
 0x15f   :  { %v375_v11 = vpop.f32.mrf.mxu0 }
 0x161   :  { %v376_v12 = vpop.f32.mrf.mxu0 }
 0x162   :  { %v377_v14 = vadd.f32 %v376_v12, %v375_v11 }
 0x163   :  { %v378_v15 = vpop.f32.mrf.mxu0 }
 0x164   :  { %v334_v16 = vadd.f32 %v377_v14, %v358_v13 }
 0x165   :  { %v379_v17 = vpop.f32.mrf.mxu0 }
 0x166   :  { %336 = vst.msk [vmem:[%s491_s5] sm:$0xff] %vm335_vm0, %v334_v16 }
 0x167   :  { %341 = vsyncpa [#allocation3], 1 }

</bundles_post_ra>
